<compile_context>
chip_gen: v6e
topology: v6e:2x2x1
jax: 0.10.0
libtpu: 0.0.40
codegen_flags: <defaults>
</compile_context>

<pallas_src>
import functools

import jax
import jax.numpy as jnp
from jax.experimental import pallas as pl
from jax.experimental.pallas import tpu as pltpu


def attention_kernel(x_ref, w_ref, b_ref, o_ref, m_sc, l_sc, acc_sc,
                     *, seq_len, seq_tile, mask_seq):
    # x_ref: (TB, TS, D)   w_ref: (1, D) VMEM   b_ref: (1, 1) SMEM
    # o_ref: (TB, D)       scratch: m_sc/l_sc (TB, 1) f32, acc_sc (TB, D) f32
    k = pl.program_id(1)
    last = pl.num_programs(1) - 1

    @pl.when(k == 0)
    def _():
        m_sc[...] = jnp.full_like(m_sc, -jnp.inf)
        l_sc[...] = jnp.zeros_like(l_sc)
        acc_sc[...] = jnp.zeros_like(acc_sc)

    x = x_ref[...]                               # native dtype (f32 or bf16)
    w = w_ref[...].astype(x.dtype)               # (1, D)
    b = b_ref[0, 0]                              # scalar bias (SMEM, f32)

    # Lane-dense scores: (TB, TS) with the sequence on the lane axis.
    # Linear(D -> 1) == VPU multiply + lane reduce over D (no MXU N=1 matmul).
    # Products stay in the input dtype; reduction/accumulation are f32.
    scores = jnp.sum((x * w).astype(jnp.float32), axis=-1) + b   # (TB, TS)

    def accumulate(sc, xv):
        # Online softmax over the seq grid axis (f32 state).
        tile_max = jnp.max(sc, axis=-1, keepdims=True)           # (TB, 1)
        m_prev = m_sc[...]
        m_new = jnp.maximum(m_prev, tile_max)
        alpha = jnp.exp(m_prev - m_new)                           # (TB, 1)
        e = jnp.exp(sc - m_new)                                   # (TB, TS)
        l_sc[...] = alpha * l_sc[...] + jnp.sum(e, axis=-1, keepdims=True)
        # Weighted sum on the VPU (bandwidth-bound kernel; avoid M=1 matmuls).
        contrib = jnp.sum((e.astype(xv.dtype)[:, :, None] * xv).astype(jnp.float32),
                          axis=1)                                 # (TB, D) f32
        acc_sc[...] = alpha * acc_sc[...] + contrib
        m_sc[...] = m_new

    if mask_seq:
        # Only the last seq tile can be partial: full tiles skip all mask work.
        @pl.when(k < last)
        def _():
            accumulate(scores, x)

        @pl.when(k == last)
        def _():
            lane = jax.lax.broadcasted_iota(jnp.int32, scores.shape, 1)
            valid = (k * seq_tile + lane) < seq_len
            s_m = jnp.where(valid, scores, -jnp.inf)
            # Zero padded x so stale (possibly non-finite) VMEM never reaches acc.
            x_m = jnp.where(valid[:, :, None], x, jnp.zeros_like(x))
            accumulate(s_m, x_m)
    else:
        accumulate(scores, x)

    @pl.when(k == last)
    def _():
        # out = sum(x * e) / sum(e)  ==  sum(x * attn) / sum(attn) (fused form).
        inv_l = pl.reciprocal(l_sc[...], approx=False)            # keep 1e-5 closeness
        o_ref[...] = (acc_sc[...] * inv_l).astype(o_ref.dtype)


def _round_up(v, m):
    return (v + m - 1) // m * m


def _tpu_config():
    """Per-generation block-size target and VMEM limit (conservative fallback)."""
    try:
        kind = jax.devices()[0].device_kind.lower().replace(" ", "")
    except Exception:
        kind = ""
    if "v7" in kind:     # 2 TC/chip, 64 MiB physical VMEM per TC, 3.2 TB/s HBM
        return {"vmem_limit": 48 << 20, "target_bytes": 10 << 20}
    if "v6" in kind:     # 128 MiB VMEM, 1.4 TB/s HBM
        return {"vmem_limit": 64 << 20, "target_bytes": 12 << 20}
    if "v5p" in kind or "v4" in kind:
        return {"vmem_limit": 64 << 20, "target_bytes": 8 << 20}
    if "v5" in kind:     # v5e: scoped default is only 16 MiB -> explicit limit matters
        return {"vmem_limit": 64 << 20, "target_bytes": 6 << 20}
    if "v2" in kind or "v3" in kind:
        return {"vmem_limit": 14 << 20, "target_bytes": 2 << 20}
    return {"vmem_limit": 32 << 20, "target_bytes": 4 << 20}


def _pick_tiles(B, S, D, itemsize, *, target_bytes, vmem_limit_bytes):
    """Pick (batch_tile, seq_tile) from the *padded* VMEM layout.

    VMEM blocks are lane/sublane padded: minor dim D -> multiple of 128, the
    seq tile -> multiple of 8.  The double-buffer (2x) factor is included when
    checking against the VMEM budget.
    """
    # min(B, 8) keeps the (TB, D) output block layout-legal (full dim or 8-mult)
    # and already yields >=2 parallel batch programs whenever B > 8.
    TB = min(B, 8)
    lane_d = _round_up(D, 128)
    row_bytes = TB * lane_d * itemsize               # padded bytes per seq position
    ts = max(8, (target_bytes // max(1, row_bytes)) // 8 * 8)
    usable = max(1 << 20, int(vmem_limit_bytes * 0.75))   # slack for scratch/out/w
    while ts > 8 and 2 * (TB * _round_up(ts, 8) * lane_d * itemsize) > usable:
        ts = max(8, (ts // 2) // 8 * 8)
    TS = S if S <= ts else ts
    return TB, TS


def attention_forward(x, w, b, *, batch_tile=None, seq_tile=None):
    """x: (B, S, D), w: (1, D), b: (1, 1)  ->  (B, D)."""
    B, S, D = x.shape
    cfg = _tpu_config()
    TB, TS = _pick_tiles(B, S, D, jnp.dtype(x.dtype).itemsize,
                         target_bytes=cfg["target_bytes"],
                         vmem_limit_bytes=cfg["vmem_limit"])
    if batch_tile is not None:
        TB = min(batch_tile, B)
    if seq_tile is not None:
        TS = min(seq_tile, S)
    nb, ns = pl.cdiv(B, TB), pl.cdiv(S, TS)
    mask_seq = (S % TS) != 0

    kernel = functools.partial(
        attention_kernel, seq_len=S, seq_tile=TS, mask_seq=mask_seq)

    return pl.pallas_call(
        kernel,
        out_shape=jax.ShapeDtypeStruct((B, D), x.dtype),
        grid=(nb, ns),
        in_specs=[
            pl.BlockSpec((TB, TS, D), lambda i, k: (i, k, 0)),          # x tile
            pl.BlockSpec((1, D), lambda i, k: (0, 0)),                  # w row
            pl.BlockSpec(memory_space=pltpu.MemorySpace.SMEM),          # bias
        ],
        out_specs=pl.BlockSpec((TB, D), lambda i, k: (i, 0)),
        scratch_shapes=[
            pltpu.VMEM((TB, 1), jnp.float32),   # running max
            pltpu.VMEM((TB, 1), jnp.float32),   # running denom
            pltpu.VMEM((TB, D), jnp.float32),   # running weighted sum
        ],
        compiler_params=pltpu.CompilerParams(
            dimension_semantics=("parallel", "arbitrary"),
            vmem_limit_bytes=cfg["vmem_limit"],
        ),
    )(x, w, b)


def reference_forward(x, w, b):
    scores = jnp.einsum("bsd,od->bso", x, w) + b[0, 0]        # (B, S, 1)
    attn = jax.nn.softmax(scores, axis=1)
    return jnp.sum(x * attn, axis=1) / jnp.sum(attn, axis=1)


if __name__ == "__main__":
    def run_check(B, S, D, **tile_overrides):
        key = jax.random.PRNGKey(0)
        kx, kw, kb = jax.random.split(key, 3)
        x = jax.random.normal(kx, (B, S, D), dtype=jnp.float32)
        # nn.Linear(embed_dim, 1): weight (1, D), bias (1,) — stored as (1, D), (1, 1)
        bound = 1.0 / float(D) ** 0.5
        w = jax.random.uniform(kw, (1, D), minval=-bound, maxval=bound,
                               dtype=jnp.float32)
        b = jax.random.uniform(kb, (1, 1), minval=-bound, maxval=bound,
                               dtype=jnp.float32)
        out = jax.block_until_ready(attention_forward(x, w, b, **tile_overrides))
        ref = reference_forward(x, w, b)
        assert out.shape == (B, D)
        assert jnp.allclose(out, ref, atol=1e-5, rtol=1e-5), (
            f"mismatch vs JAX reference for B={B} S={S} D={D}")

    # Canonical small shape implied by the module (batch=2, seq=8, embed_dim=32).
    run_check(2, 8, 32)
    # Exercise the multi-tile online-softmax path, the masked partial seq tile,
    # and a padded final batch tile (B % TB != 0, S % TS != 0).
    run_check(10, 40, 32, seq_tile=16)

    print("KERNEL_OK")
</pallas_src>

<mosaic_0001>
module attributes {stable_mosaic.version = 11 : i64} {
  func.func @attention_kernel(%arg0: i32, %arg1: i32, %arg2: memref<2x8x32xf32, #tpu.memory_space<vmem>>, %arg3: memref<1x32xf32, #tpu.memory_space<vmem>>, %arg4: memref<1x1xf32, #tpu.memory_space<smem>>, %arg5: memref<2x32xf32, #tpu.memory_space<vmem>>, %arg6: memref<2x1xf32, #tpu.memory_space<vmem>>, %arg7: memref<2x1xf32, #tpu.memory_space<vmem>>, %arg8: memref<2x32xf32, #tpu.memory_space<vmem>>) attributes {dimension_semantics = [#tpu.dimension_semantics<parallel>, #tpu.dimension_semantics<arbitrary>], iteration_bounds = array<i64: 1, 1>, scalar_prefetch = 0 : i64, scratch_operands = 3 : i64, tpu.core_type = #tpu.core_type<tc>, window_params = [{transform_indices = @transform_0, window_bounds = array<i64: 2, 8, 32>}, {pipeline_mode = #tpu.pipeline_mode<synchronous>, transform_indices = @transform_1, window_bounds = array<i64: 1, 32>}, {transform_indices = @transform_2, window_bounds = array<i64: 1, 1>}, {transform_indices = @transform_3, window_bounds = array<i64: 2, 32>}]} {
    %c0_i32 = arith.constant 0 : i32
    %0 = arith.cmpi eq, %arg1, %c0_i32 : i32
    %1 = arith.extui %0 : i1 to i32
    %c0_i32_0 = arith.constant 0 : i32
    %2 = arith.cmpi ne, %1, %c0_i32_0 : i32
    scf.if %2 {
      %cst_24 = arith.constant 0xFF800000 : f32
      %40 = vector.broadcast %cst_24 : f32 to vector<2x1xf32>
      %c0_25 = arith.constant 0 : index
      %c0_26 = arith.constant 0 : index
      %41 = vector.load %arg6[%c0_25, %c0_26] : memref<2x1xf32, #tpu.memory_space<vmem>>, vector<2x1xf32>
      tpu.vector_store %arg6[%c0_25, %c0_26], %40 {strides = array<i32>} : memref<2x1xf32, #tpu.memory_space<vmem>>, vector<2x1xf32>,
      %cst_27 = arith.constant 0.000000e+00 : f32
      %42 = vector.broadcast %cst_27 : f32 to vector<2x1xf32>
      %c0_28 = arith.constant 0 : index
      %c0_29 = arith.constant 0 : index
      %43 = vector.load %arg7[%c0_28, %c0_29] : memref<2x1xf32, #tpu.memory_space<vmem>>, vector<2x1xf32>
      tpu.vector_store %arg7[%c0_28, %c0_29], %42 {strides = array<i32>} : memref<2x1xf32, #tpu.memory_space<vmem>>, vector<2x1xf32>,
      %cst_30 = arith.constant 0.000000e+00 : f32
      %44 = vector.broadcast %cst_30 : f32 to vector<2x32xf32>
      %c0_31 = arith.constant 0 : index
      %c0_32 = arith.constant 0 : index
      %45 = vector.load %arg8[%c0_31, %c0_32] : memref<2x32xf32, #tpu.memory_space<vmem>>, vector<2x32xf32>
      tpu.vector_store %arg8[%c0_31, %c0_32], %44 {strides = array<i32>} : memref<2x32xf32, #tpu.memory_space<vmem>>, vector<2x32xf32>,
    } else {
    }
    %c0 = arith.constant 0 : index
    %c0_1 = arith.constant 0 : index
    %c0_2 = arith.constant 0 : index
    %3 = vector.load %arg2[%c0, %c0_1, %c0_2] : memref<2x8x32xf32, #tpu.memory_space<vmem>>, vector<2x8x32xf32>
    %c0_3 = arith.constant 0 : index
    %c0_4 = arith.constant 0 : index
    %4 = vector.load %arg3[%c0_3, %c0_4] : memref<1x32xf32, #tpu.memory_space<vmem>>, vector<1x32xf32>
    %c0_5 = arith.constant 0 : index
    %c0_6 = arith.constant 0 : index
    %5 = memref.load %arg4[%c0_5, %c0_6] : memref<1x1xf32, #tpu.memory_space<smem>>
    %6 = vector.shape_cast %4 : vector<1x32xf32> to vector<1x1x32xf32>
    %7 = vector.broadcast %6 : vector<1x1x32xf32> to vector<2x8x32xf32>
    %8 = arith.mulf %3, %7 : vector<2x8x32xf32>
    %cst = arith.constant dense<0.000000e+00> : vector<2x8xf32>
    %9 = vector.multi_reduction <add>, %8, %cst [2] : vector<2x8x32xf32> to vector<2x8xf32>
    %10 = vector.broadcast %5 : f32 to vector<2x8xf32>
    %11 = arith.addf %9, %10 : vector<2x8xf32>
    %cst_7 = arith.constant dense<0xFF800000> : vector<2xf32>
    %12 = vector.multi_reduction <maximumf>, %11, %cst_7 [1] : vector<2x8xf32> to vector<2xf32>
    %13 = vector.shape_cast %12 : vector<2xf32> to vector<2x1xf32>
    %c0_8 = arith.constant 0 : index
    %c0_9 = arith.constant 0 : index
    %14 = vector.load %arg6[%c0_8, %c0_9] : memref<2x1xf32, #tpu.memory_space<vmem>>, vector<2x1xf32>
    %15 = arith.maximumf %14, %13 : vector<2x1xf32>
    %16 = arith.subf %14, %15 : vector<2x1xf32>
    %17 = math.exp %16 : vector<2x1xf32>
    %18 = vector.broadcast %15 : vector<2x1xf32> to vector<2x8xf32>
    %19 = arith.subf %11, %18 : vector<2x8xf32>
    %20 = math.exp %19 : vector<2x8xf32>
    %c0_10 = arith.constant 0 : index
    %c0_11 = arith.constant 0 : index
    %21 = vector.load %arg7[%c0_10, %c0_11] : memref<2x1xf32, #tpu.memory_space<vmem>>, vector<2x1xf32>
    %22 = arith.mulf %17, %21 : vector<2x1xf32>
    %cst_12 = arith.constant dense<0.000000e+00> : vector<2xf32>
    %23 = vector.multi_reduction <add>, %20, %cst_12 [1] : vector<2x8xf32> to vector<2xf32>
    %24 = vector.shape_cast %23 : vector<2xf32> to vector<2x1xf32>
    %25 = arith.addf %22, %24 : vector<2x1xf32>
    %c0_13 = arith.constant 0 : index
    %c0_14 = arith.constant 0 : index
    %26 = vector.load %arg7[%c0_13, %c0_14] : memref<2x1xf32, #tpu.memory_space<vmem>>, vector<2x1xf32>
    tpu.vector_store %arg7[%c0_13, %c0_14], %25 {strides = array<i32>} : memref<2x1xf32, #tpu.memory_space<vmem>>, vector<2x1xf32>,
    %27 = vector.shape_cast %20 : vector<2x8xf32> to vector<2x8x1xf32>
    %28 = vector.broadcast %27 : vector<2x8x1xf32> to vector<2x8x32xf32>
    %29 = arith.mulf %28, %3 : vector<2x8x32xf32>
    %cst_15 = arith.constant dense<0.000000e+00> : vector<2x32xf32>
    %30 = vector.multi_reduction <add>, %29, %cst_15 [1] : vector<2x8x32xf32> to vector<2x32xf32>
    %c0_16 = arith.constant 0 : index
    %c0_17 = arith.constant 0 : index
    %31 = vector.load %arg8[%c0_16, %c0_17] : memref<2x32xf32, #tpu.memory_space<vmem>>, vector<2x32xf32>
    %32 = vector.broadcast %17 : vector<2x1xf32> to vector<2x32xf32>
    %33 = arith.mulf %32, %31 : vector<2x32xf32>
    %34 = arith.addf %33, %30 : vector<2x32xf32>
    %c0_18 = arith.constant 0 : index
    %c0_19 = arith.constant 0 : index
    %35 = vector.load %arg8[%c0_18, %c0_19] : memref<2x32xf32, #tpu.memory_space<vmem>>, vector<2x32xf32>
    tpu.vector_store %arg8[%c0_18, %c0_19], %34 {strides = array<i32>} : memref<2x32xf32, #tpu.memory_space<vmem>>, vector<2x32xf32>,
    %c0_20 = arith.constant 0 : index
    %c0_21 = arith.constant 0 : index
    %36 = vector.load %arg6[%c0_20, %c0_21] : memref<2x1xf32, #tpu.memory_space<vmem>>, vector<2x1xf32>
    tpu.vector_store %arg6[%c0_20, %c0_21], %15 {strides = array<i32>} : memref<2x1xf32, #tpu.memory_space<vmem>>, vector<2x1xf32>,
    %c0_i32_22 = arith.constant 0 : i32
    %37 = arith.cmpi eq, %arg1, %c0_i32_22 : i32
    %38 = arith.extui %37 : i1 to i32
    %c0_i32_23 = arith.constant 0 : i32
    %39 = arith.cmpi ne, %38, %c0_i32_23 : i32
    scf.if %39 {
      %c0_24 = arith.constant 0 : index
      %c0_25 = arith.constant 0 : index
      %40 = vector.load %arg7[%c0_24, %c0_25] : memref<2x1xf32, #tpu.memory_space<vmem>>, vector<2x1xf32>
      %41 = tpu.reciprocal %40 : vector<2x1xf32> -> vector<2x1xf32>
      %c0_26 = arith.constant 0 : index
      %c0_27 = arith.constant 0 : index
      %42 = vector.load %arg8[%c0_26, %c0_27] : memref<2x32xf32, #tpu.memory_space<vmem>>, vector<2x32xf32>
      %43 = vector.broadcast %41 : vector<2x1xf32> to vector<2x32xf32>
      %44 = arith.mulf %42, %43 : vector<2x32xf32>
      %c0_28 = arith.constant 0 : index
      %c0_29 = arith.constant 0 : index
      %45 = vector.load %arg5[%c0_28, %c0_29] : memref<2x32xf32, #tpu.memory_space<vmem>>, vector<2x32xf32>
      tpu.vector_store %arg5[%c0_28, %c0_29], %44 {strides = array<i32>} : memref<2x32xf32, #tpu.memory_space<vmem>>, vector<2x32xf32>,
    } else {
    }
    return
  }
  func.func @transform_0(%arg0: i32, %arg1: i32) -> (i32, i32, i32) {
    %c0_i32 = arith.constant 0 : i32
    %c0_i32_0 = arith.constant 0 : i32
    return %arg0, %arg1, %c0_i32 : i32, i32, i32
  }
  func.func @transform_1(%arg0: i32, %arg1: i32) -> (i32, i32) {
    %c0_i32 = arith.constant 0 : i32
    %c0_i32_0 = arith.constant 0 : i32
    %c0_i32_1 = arith.constant 0 : i32
    return %c0_i32, %c0_i32_0 : i32, i32
  }
  func.func @transform_2(%arg0: i32, %arg1: i32) -> (i32, i32) {
    %c0_i32 = arith.constant 0 : i32
    %c0_i32_0 = arith.constant 0 : i32
    %c0_i32_1 = arith.constant 0 : i32
    return %c0_i32, %c0_i32_0 : i32, i32
  }
  func.func @transform_3(%arg0: i32, %arg1: i32) -> (i32, i32) {
    %c0_i32 = arith.constant 0 : i32
    %c0_i32_0 = arith.constant 0 : i32
    return %arg0, %c0_i32 : i32, i32
  }
}

</mosaic_0001>

<bundles_post_ra>
// kernel: tpu_custom_call.1
= control target key start
LH: loop header
LB: loop body
LE: loop exit
PB: predicated region body
PF: predicated region fallthrough
CT: control target
= control target key end

     0   :  { %9 = vsyncpa [#allocation7], 0  ;;  %s317_s0 = inlined_call_operand.hbm [shape: f32[2,8,32], index: 0, kind: input, shape index: {}]   ;;  %s318_s1 = inlined_call_operand.vmem [shape: f32[1,32], index: 1, kind: input, shape index: {}]   ;;  %s319_s2 = inlined_call_operand.<no memory space> [shape: f32[1,1], index: 2, kind: input, shape index: {}]   ;;  %s320_s3 = inlined_call_operand.hbm [shape: f32[2,32], index: 3, kind: output, shape index: {}]  }
   0x1   :  { %10 = vsyncpa [#allocation8], 0  ;;  %s254_s12 = smov [#allocation6]  }
   0x2   :  { %s16_s13 = sshll.u32 %s254_s12, 4  ;;  %s17_s13 = int_to_ptr.vmem [resolvable:$true] %s16_s13 }
   0x3   :  { %s218_s14 = scalar_lea.vmem %s17_s13, 256  ;;  %p223_p1 = scmp.lt.s32.totalorder %s17_s13, %s17_s13 }
   0x4   :  { %p219_p0 = scmp.ne.s32.totalorder %s17_s13, %s218_s14  ;;  %p224_p2 = scmp.lt.s32.totalorder %s218_s14, %s218_s14 }
   0x6   :  { %p225_p3 = por %p224_p2, %p223_p1 }
   0x8   :  { %p226_p4 = pnand %p225_p3, %p219_p0 }
   0xa   :  { %229 = shalt.err (!%p226_p4)
}
   0xb   :  { %s255_s15 = smov 128   ;;  %s256_s16 = smov 8  }
   0xc   :  { %22 = dma.hbm_to_vmem [thread:$0]  %s317_s0, 256, %s17_s13, [#allocation7], %s255_s15, %s255_s15, %s256_s16  }
   0xd   :  { %250 = dma.done.wait [#allocation7], 256  }
   0xe   :  { %251 = vsyncadd [#allocation7], 4294967040  ;;  %v284_v0 = vld [vmem:[#allocation6] sm:$0xff]  ;;  %v192_v1 = vld [vmem:[%s318_s1] ss:$0 sm:$0xff]  ;;  %vm51_vm0 = vcmask 261120   ;;  %v63_v8 = vlaneseq  ;;  %v58_v11 = vstv %s319_s2 }
   0xf   :  { %v289_v2 = vld [vmem:[#allocation6 + $0x8] sm:$0xff]  ;;  %v49_v3 = vmul.f32 %v192_v1, %v284_v0  ;;  %vm34_vm1 = vcmask 1024   ;;  %v257_v7 = vmov -inf   ;;  %vm73_vm2 = vcmask 1041409   ;;  %s260_s2 = smov [#allocation9]  }
  0x10   :  { %v50_v4 = vmul.f32 %v192_v1, %v289_v2  ;;  %35 = vst.msk [vmem:[#allocation2] sm:$0x3] %vm34_vm1, %v257_v7  ;;  %v64_v9 = vand.u32 127, %v63_v8  ;;  %v66_v10 = vshrl.u32 %v63_v8, 7  ;;  %vm76_vm3 = vcmask 58368   ;;  %s183_s21 = sshll.u32 %s260_s2, 4  ;;  %s184_s21 = int_to_ptr.vmem [resolvable:$true] %s183_s21 }
  0x11   :  { %v52_v5 = vsel %vm51_vm0, %v49_v3, 0.0  ;;  %v258_v21 = vmov 0   ;;  %v259_v22 = vmov 0.0   ;;  %vm37_vm4 = vcmask 254976   ;;  %s230_s22 = scalar_lea.vmem %s184_s21, 32  ;;  %p235_p6 = scmp.lt.s32.totalorder %s184_s21, %s184_s21 }
  0x12   :  { %53 = vadd.xlane.f32.xlu0 %v52_v5  ;;  %v55_v6 = vsel %vm51_vm0, %v50_v4, 0.0  ;;  %v67_v13 = vsub.s32 %v64_v9, %v66_v10  ;;  %200 = vset.pattern.permute.xlu1 %v258_v21  ;;  %36 = vst.msk [vmem:[#allocation3] sm:$0x3] %vm34_vm1, %v259_v22  ;;  %v91_v27 = vsub.s32 0, %v66_v10  ;;  %v95_v28 = vsub.s32 1, %v66_v10  ;;  %p231_p5 = scmp.ne.s32.totalorder %s184_s21, %s230_s22  ;;  %p236_p7 = scmp.lt.s32.totalorder %s230_s22, %s230_s22 }
  0x13   :  { %201 = vset.pattern.permute.xlu0 %v258_v21  ;;  %38 = vst.msk [vmem:[#allocation4] sm:$0x3] %vm37_vm4, %v259_v22 }
  0x14   :  { %p237_p8 = por %p236_p7, %p235_p6 }
  0x16   :  { %56 = vadd.xlane.f32.xlu0 %v55_v6  ;;  %p238_p9 = pnand %p237_p8, %p231_p5 }
  0x17   :  { %v80_v23 = vld [vmem:[#allocation2] sm:$0x3] }
  0x19   :  { %v105_v3 = vld [vmem:[#allocation3] sm:$0x3] }
  0x1a   :  { %v149_v60 = vld [vmem:[#allocation4] sm:$0x3] }
  0x9b   :  { %v54_v12 = vpop.xlane.xlu0 %53 }
  0x9c   :  { %v59_v14 = vadd.f32 %v58_v11, %v54_v12 }
  0x9e   :  { %v68_v17 = vrot.slane %v59_v14, %v67_v13 }
  0x9f   :  { %v57_v15 = vpop.xlane.xlu0 %56 }
  0xa0   :  { %v60_v16 = vadd.f32 %v58_v11, %v57_v15 }
  0xa2   :  { %v72_v18 = vrot.slane %v60_v16, %v67_v13 }
  0xa4   :  { %v74_v19 = vsel %vm73_vm2, %v72_v18, %v68_v17 }
  0xa5   :  { %v77_v20 = vsel %vm76_vm3, %v74_v19, -inf }
  0xa6   :  { %78 = vmax.xlane.f32.xlu1 %v77_v20 }
 0x12f   :  { %v79_v24 = vpop.xlane.xlu1 %78 }
 0x130   :  { %v81_v25 = vmax.f32 %v80_v23, %v79_v24 }
 0x132   :  { %v82_v26 = vsub.f32 %v80_v23, %v81_v25  ;;  %163 = vst.msk [vmem:[#allocation2] sm:$0x3] %vm34_vm1, %v81_v25  ;;  %87 = vperm.xlu1 %200, %v81_v25  }
 0x134   :  { %v83_v36 = vmul.f32 1.442695, %v82_v26 }
 0x1ad   :  { %v88_v29 = vpop.permute.xlu1 %87 }
 0x1ae   :  { %v92_v30 = vrot.slane %v88_v29, %v91_v27  ;;  %v96_v31 = vrot.slane %v88_v29, %v95_v28 }
 0x1b0   :  { %v99_v32 = vsub.f32 %v59_v14, %v92_v30  ;;  %v100_v33 = vsub.f32 %v60_v16, %v96_v31 }
 0x1b2   :  { %v101_v34 = vmul.f32 1.442695, %v99_v32  ;;  %v103_v35 = vmul.f32 1.442695, %v100_v33 }
 0x1b4   :  { %202 = vpow2.f32 %v101_v34 }
 0x1b5   :  { %204 = vpow2.f32 %v103_v35 }
 0x1b6   :  { %206 = vpow2.f32 %v83_v36 }
 0x1c1   :  { %v203_v37 = vpop.eup %202 }
 0x1c2   :  { %v205_v38 = vpop.eup %204  ;;  %110 = vperm.xlu0 %201, %v203_v37  }
 0x1c3   :  { %113 = vperm.xlu1 %200, %v205_v38   ;;  %v207_v39 = vpop.eup %206 }
 0x1c4   :  { %v106_v4 = vmul.f32 %v207_v39, %v105_v3 }
 0x1c6   :  { %152 = vperm.xlu0 %201, %v207_v39  }
 0x23d   :  { %v111_v40 = vpop.permute.xlu0 %110 }
 0x23e   :  { %v114_v41 = vpop.permute.xlu1 %113  ;;  %v118_v42 = vrot.slane %v111_v40, %v67_v13  ;;  %v133_v43 = vmul.f32 %v111_v40, %v284_v0 }
 0x23f   :  { %v122_v44 = vrot.slane %v114_v41, %v67_v13  ;;  %v134_v45 = vmul.f32 %v114_v41, %v289_v2 }
 0x240   :  { %v135_v46 = vsel %vm51_vm0, %v133_v43, 0.0 }
 0x241   :  { %v142_v47 = vsel %vm51_vm0, %v134_v45, 0.0  ;;  %v136_v48 = vrot.slane %v135_v46, 4  ;;  %v123_v49 = vsel %vm73_vm2, %v122_v44, %v118_v42  ;;  %v153_v61 = vpop.permute.xlu0 %152 }
 0x242   :  { %v143_v50 = vrot.slane %v142_v47, 4  ;;  %v125_v51 = vsel %vm76_vm3, %v123_v49, 0.0  ;;  %v155_v0 = vmul.f32 %v153_v61, %v149_v60 }
 0x243   :  { %v137_v52 = vadd.f32 %v136_v48, %v135_v46  ;;  %126 = vadd.xlane.f32.xlu1 %v125_v51 }
 0x244   :  { %v144_v53 = vadd.f32 %v143_v50, %v142_v47 }
 0x245   :  { %v138_v54 = vrot.slane %v137_v52, 2 }
 0x246   :  { %v145_v55 = vrot.slane %v144_v53, 2 }
 0x247   :  { %v139_v56 = vadd.f32 %v138_v54, %v137_v52 }
 0x248   :  { %v146_v57 = vadd.f32 %v145_v55, %v144_v53 }
 0x249   :  { %v140_v58 = vrot.slane %v139_v56, 1 }
 0x24a   :  { %v147_v59 = vrot.slane %v146_v57, 1 }
 0x24b   :  { %v141_v62 = vadd.f32 %v140_v58, %v139_v56 }
 0x24c   :  { %v148_v63 = vadd.f32 %v147_v59, %v146_v57 }
 0x24e   :  { %v158_v1 = vsel %vm73_vm2, %v148_v63, %v141_v62 }
 0x24f   :  { %v160_v2 = vadd.f32 %v158_v1, %v155_v0 }
 0x251   :  { %162 = vst.msk [vmem:[#allocation4] sm:$0x3] %vm37_vm4, %v160_v2 }
 0x258   :  { %v169_v9 = vld [vmem:[#allocation4] sm:$0x3] }
 0x2cc   :  { %v127_v5 = vpop.xlane.xlu1 %126 }
 0x2cd   :  { %v128_v6 = vadd.f32 %v127_v5, %v106_v4 }
 0x2cf   :  { %130 = vst.msk [vmem:[#allocation3] sm:$0x3] %vm34_vm1, %v128_v6 }
 0x2d6   :  { %v167_v7 = vld [vmem:[#allocation3] sm:$0x3] }
 0x2d7   :  { %208 = vrcp.f32 %v167_v7 }
 0x2e4   :  { %v209_v8 = vpop.eup %208 }
 0x2e5   :  { %172 = vperm.xlu0 %201, %v209_v8  }
 0x360   :  { %v173_v10 = vpop.permute.xlu0 %172 }
 0x361   :  { %v175_v11 = vmul.f32 %v173_v10, %v169_v9 }
 0x363   :  { %176 = vst.msk [vmem:[#allocation9] sm:$0x3] %vm37_vm4, %v175_v11 }
 0x364   :  { %241 = shalt.err (!%p238_p9)
}
 0x365   :  { %186 = dma.vmem_to_hbm [thread:$0]  %s184_s21, 32, %s320_s3, [#allocation8]  }
 0x366   :  { %252 = dma.done.wait [#allocation8], 32  }
 0x367   :  { %253 = vsyncadd [#allocation8], 4294967264 }
 0x368   :  { %190 = vsyncpa [#allocation7], 1 }
 0x369   :  { %191 = vsyncpa [#allocation8], 1 }

</bundles_post_ra>
